<compile_context>
chip_gen: v6e
topology: v6e:2x2x1
jax: 0.10.0
libtpu: 0.0.40
codegen_flags: <defaults>
</compile_context>

<pallas_src>
import functools

import jax
import jax.numpy as jnp
from jax.experimental import pallas as pl
from jax.experimental.pallas import tpu as pltpu


def _round_up(x, m):
    return ((x + m - 1) // m) * m


def _encoder_kernel(img_ref, st_ref, w_img_ref, w_st_ref, out_ref):
    # Two MXU pushes per B-tile (image path + state/bias path), one f32 VPU
    # add, one lane-dense unmasked f32 store.  Weights are VMEM-resident.
    acc = jnp.dot(img_ref[...], w_img_ref[...],
                  preferred_element_type=jnp.float32)
    acc = acc + jnp.dot(st_ref[...], w_st_ref[...],
                        preferred_element_type=jnp.float32)
    out_ref[...] = acc


def pack_encoder_weights(w_img, b_img, w_st, b_st,
                         compute_dtype=jnp.bfloat16):
    """One-time packing of the per-modality Linear weights.

    Returns:
      w_img_p: (K_img_pad, N_pad)  image weights -> output lanes [:F]
      w_st_p:  (K_st_pad,  N_pad)  state  weights -> output lanes [F:2F];
               row D holds BOTH folded biases (paired with a ones-column in
               the state activation).
    """
    K_img, F = w_img.shape
    D = w_st.shape[0]
    N_out = 2 * F
    N_pad = _round_up(max(N_out, 128), 128)      # lane-dense output
    K_img_pad = _round_up(K_img, 128)
    K_st_pad = _round_up(D + 1, 128)             # +1 ones column for the biases

    w_img_p = jnp.zeros((K_img_pad, N_pad), jnp.float32)
    w_img_p = w_img_p.at[:K_img, :F].set(w_img)

    w_st_p = jnp.zeros((K_st_pad, N_pad), jnp.float32)
    w_st_p = w_st_p.at[:D, F:N_out].set(w_st)
    w_st_p = w_st_p.at[D, :F].set(jnp.reshape(b_img, (F,)))
    w_st_p = w_st_p.at[D, F:N_out].set(jnp.reshape(b_st, (F,)))

    return w_img_p.astype(compute_dtype), w_st_p.astype(compute_dtype)


def observation_encoder_forward(img, state, w_img_p, w_st_p, *,
                                n_state, feature_dim,
                                tm_target=256, compute_dtype=jnp.bfloat16):
    """ObservationEncoder forward (feature_aggregation='concat').

    img:   (B, C, H, W) f32  -> Flatten + Linear(C*H*W, F)
    state: (B, D) f32        -> Linear(D, F)
    returns: (B, 2*F) f32  == concat([img_feat, state_feat], dim=-1)
    """
    B = img.shape[0]
    K_img = 1
    for d in img.shape[1:]:
        K_img *= d
    D = n_state
    F = feature_dim
    N_out = 2 * F

    K_img_pad, N_pad = w_img_p.shape
    K_st_pad = w_st_p.shape[0]

    # ---- batch tiling -------------------------------------------------------
    tm = tm_target if B >= tm_target else _round_up(B, 8)
    B_pad = _round_up(B, tm)
    grid = (B_pad // tm,)

    # ---- activations: reshape + bf16 cast only (no big fused-matrix build) --
    img_flat = img.reshape(B, K_img).astype(compute_dtype)   # == torch .flatten(1)
    if B_pad != B or K_img_pad != K_img:
        img_flat = jnp.pad(img_flat, ((0, B_pad - B), (0, K_img_pad - K_img)))

    # state + ones column (the folded-bias row in w_st_p multiplies this 1.0)
    st_aug = jnp.zeros((B_pad, K_st_pad), compute_dtype)
    st_aug = st_aug.at[:B, :D].set(state.astype(compute_dtype))
    st_aug = st_aug.at[:B, D].set(jnp.ones((B,), compute_dtype))

    out_padded = pl.pallas_call(
        _encoder_kernel,
        out_shape=jax.ShapeDtypeStruct((B_pad, N_pad), jnp.float32),
        grid=grid,
        in_specs=[
            # activation tiles stream over the B grid axis
            pl.BlockSpec((tm, K_img_pad), lambda i: (i, 0)),
            pl.BlockSpec((tm, K_st_pad), lambda i: (i, 0)),
            # weights: same block every step -> loaded once, VMEM-resident
            pl.BlockSpec((K_img_pad, N_pad), lambda i: (0, 0)),
            pl.BlockSpec((K_st_pad, N_pad), lambda i: (0, 0)),
        ],
        out_specs=pl.BlockSpec((tm, N_pad), lambda i: (i, 0)),
        compiler_params=pltpu.CompilerParams(
            # independent B-tiles -> shard grid steps across TCs on v7x megacore
            dimension_semantics=("parallel",)),
    )(img_flat, st_aug, w_img_p, w_st_p)

    # slice away batch / lane padding
    return out_padded[:B, :N_out]


if __name__ == "__main__":
    # Small shapes consistent with the module's registered modalities.
    B, C, H, W = 2, 4, 16, 16
    D = 8
    F = 32  # feature_dim

    key = jax.random.PRNGKey(0)
    k1, k2, k3, k4, k5, k6 = jax.random.split(key, 6)

    img = jax.random.normal(k1, (B, C, H, W), dtype=jnp.float32)
    state = jax.random.normal(k2, (B, D), dtype=jnp.float32)

    K_img = C * H * W
    w_img = (jax.random.uniform(k3, (K_img, F), dtype=jnp.float32) - 0.5) * (2.0 / jnp.sqrt(K_img))
    b_img = (jax.random.uniform(k4, (1, F), dtype=jnp.float32) - 0.5) * (2.0 / jnp.sqrt(K_img))
    w_st = (jax.random.uniform(k5, (D, F), dtype=jnp.float32) - 0.5) * (2.0 / jnp.sqrt(D))
    b_st = (jax.random.uniform(k6, (1, F), dtype=jnp.float32) - 0.5) * (2.0 / jnp.sqrt(D))

    # --- one-time weight packing (hoisted out of the forward) ---------------
    w_img_p, w_st_p = pack_encoder_weights(w_img, b_img, w_st, b_st)
    w_img_p = jax.block_until_ready(w_img_p)
    w_st_p = jax.block_until_ready(w_st_p)

    fwd = jax.jit(functools.partial(observation_encoder_forward,
                                    n_state=D, feature_dim=F))

    out = fwd(img, state, w_img_p, w_st_p)
    out = jax.block_until_ready(out)
    assert out.shape == (B, 2 * F)

    # --- reference 1: same-precision (bf16 inputs, f32 accumulation) --------
    img_bf = img.reshape(B, K_img).astype(jnp.bfloat16)
    st_bf = state.astype(jnp.bfloat16)
    ref_img_bf = jnp.dot(img_bf, w_img.astype(jnp.bfloat16),
                         preferred_element_type=jnp.float32) \
        + b_img.astype(jnp.bfloat16).astype(jnp.float32)
    ref_st_bf = jnp.dot(st_bf, w_st.astype(jnp.bfloat16),
                        preferred_element_type=jnp.float32) \
        + b_st.astype(jnp.bfloat16).astype(jnp.float32)
    ref_bf = jnp.concatenate([ref_img_bf, ref_st_bf], axis=-1)
    assert jnp.allclose(out, ref_bf, atol=2e-3, rtol=2e-3), \
        "mismatch vs bf16-precision reference"

    # --- reference 2: exact f32 forward (module semantics) ------------------
    ref_f32 = jnp.concatenate([img.reshape(B, K_img) @ w_img + b_img,
                               state @ w_st + b_st], axis=-1)
    assert jnp.allclose(out, ref_f32, atol=5e-2, rtol=5e-2), \
        "mismatch vs f32 reference"

    print("KERNEL_OK")
</pallas_src>

<mosaic_0001>
module attributes {stable_mosaic.version = 11 : i64} {
  func.func @_encoder_kernel(%arg0: i32, %arg1: memref<8x1024xbf16, #tpu.memory_space<vmem>>, %arg2: memref<8x128xbf16, #tpu.memory_space<vmem>>, %arg3: memref<1024x128xbf16, #tpu.memory_space<vmem>>, %arg4: memref<128x128xbf16, #tpu.memory_space<vmem>>, %arg5: memref<8x128xf32, #tpu.memory_space<vmem>>) attributes {dimension_semantics = [#tpu.dimension_semantics<parallel>], iteration_bounds = array<i64: 1>, scalar_prefetch = 0 : i64, scratch_operands = 0 : i64, tpu.core_type = #tpu.core_type<tc>, window_params = [{transform_indices = @transform_0, window_bounds = array<i64: 8, 1024>}, {transform_indices = @transform_1, window_bounds = array<i64: 8, 128>}, {pipeline_mode = #tpu.pipeline_mode<synchronous>, transform_indices = @transform_2, window_bounds = array<i64: 1024, 128>}, {pipeline_mode = #tpu.pipeline_mode<synchronous>, transform_indices = @transform_3, window_bounds = array<i64: 128, 128>}, {transform_indices = @transform_4, window_bounds = array<i64: 8, 128>}]} {
    %c0 = arith.constant 0 : index
    %c0_0 = arith.constant 0 : index
    %0 = vector.load %arg1[%c0, %c0_0] : memref<8x1024xbf16, #tpu.memory_space<vmem>>, vector<8x1024xbf16>
    %c0_1 = arith.constant 0 : index
    %c0_2 = arith.constant 0 : index
    %1 = vector.load %arg3[%c0_1, %c0_2] : memref<1024x128xbf16, #tpu.memory_space<vmem>>, vector<1024x128xbf16>
    %cst = arith.constant dense<0.000000e+00> : vector<8x128xf32>
    %2 = tpu.matmul %0, %1, %cst {dimension_numbers = #tpu.dot_dimension_numbers<[1], [0], [0], [1], [0, 0, 1, 1], [], []>} : vector<8x1024xbf16>, vector<1024x128xbf16>, vector<8x128xf32> -> vector<8x128xf32>
    %c0_3 = arith.constant 0 : index
    %c0_4 = arith.constant 0 : index
    %3 = vector.load %arg2[%c0_3, %c0_4] : memref<8x128xbf16, #tpu.memory_space<vmem>>, vector<8x128xbf16>
    %c0_5 = arith.constant 0 : index
    %c0_6 = arith.constant 0 : index
    %4 = vector.load %arg4[%c0_5, %c0_6] : memref<128x128xbf16, #tpu.memory_space<vmem>>, vector<128x128xbf16>
    %cst_7 = arith.constant dense<0.000000e+00> : vector<8x128xf32>
    %5 = tpu.matmul %3, %4, %cst_7 {dimension_numbers = #tpu.dot_dimension_numbers<[1], [0], [0], [1], [0, 0, 1, 1], [], []>} : vector<8x128xbf16>, vector<128x128xbf16>, vector<8x128xf32> -> vector<8x128xf32>
    %6 = arith.addf %2, %5 : vector<8x128xf32>
    %c0_8 = arith.constant 0 : index
    %c0_9 = arith.constant 0 : index
    %7 = vector.load %arg5[%c0_8, %c0_9] : memref<8x128xf32, #tpu.memory_space<vmem>>, vector<8x128xf32>
    tpu.vector_store %arg5[%c0_8, %c0_9], %6 {strides = array<i32>} : memref<8x128xf32, #tpu.memory_space<vmem>>, vector<8x128xf32>,
    return
  }
  func.func @transform_0(%arg0: i32) -> (i32, i32) {
    %c0_i32 = arith.constant 0 : i32
    %c0_i32_0 = arith.constant 0 : i32
    return %arg0, %c0_i32 : i32, i32
  }
  func.func @transform_1(%arg0: i32) -> (i32, i32) {
    %c0_i32 = arith.constant 0 : i32
    %c0_i32_0 = arith.constant 0 : i32
    return %arg0, %c0_i32 : i32, i32
  }
  func.func @transform_2(%arg0: i32) -> (i32, i32) {
    %c0_i32 = arith.constant 0 : i32
    %c0_i32_0 = arith.constant 0 : i32
    %c0_i32_1 = arith.constant 0 : i32
    return %c0_i32, %c0_i32_0 : i32, i32
  }
  func.func @transform_3(%arg0: i32) -> (i32, i32) {
    %c0_i32 = arith.constant 0 : i32
    %c0_i32_0 = arith.constant 0 : i32
    %c0_i32_1 = arith.constant 0 : i32
    return %c0_i32, %c0_i32_0 : i32, i32
  }
  func.func @transform_4(%arg0: i32) -> (i32, i32) {
    %c0_i32 = arith.constant 0 : i32
    %c0_i32_0 = arith.constant 0 : i32
    return %arg0, %c0_i32 : i32, i32
  }
}

</mosaic_0001>

<bundles_post_ra>
// kernel: observation_encoder_forward.1
= control target key start
LH: loop header
LB: loop body
LE: loop exit
PB: predicated region body
PF: predicated region fallthrough
CT: control target
= control target key end

     0   :  { %9 = vsyncpa [#allocation3], 0  ;;  %s1151_s15 = smov [#allocation2]   ;;  %s1226_s0 = inlined_call_operand.vmem [shape: bf16[8,1024], index: 0, kind: input, shape index: {}]   ;;  %s1227_s1 = inlined_call_operand.vmem [shape: bf16[8,128], index: 1, kind: input, shape index: {}]   ;;  %s1228_s2 = inlined_call_operand.hbm [shape: bf16[1024,128], index: 2, kind: input, shape index: {}]   ;;  %s1229_s3 = inlined_call_operand.vmem [shape: bf16[128,128], index: 3, kind: input, shape index: {}]   ;;  %s1230_s4 = inlined_call_operand.vmem [shape: f32[8,128], index: 4, kind: output, shape index: {}]  }
   0x1   :  { %s19_s16 = sshll.u32 %s1151_s15, 4  ;;  %s20_s16 = int_to_ptr.vmem [resolvable:$true] %s19_s16 }
   0x2   :  { %s1137_s17 = scalar_lea.vmem %s20_s16, 8192  ;;  %p1142_p1 = scmp.lt.s32.totalorder %s20_s16, %s20_s16 }
   0x3   :  { %p1138_p0 = scmp.ne.s32.totalorder %s20_s16, %s1137_s17  ;;  %p1143_p2 = scmp.lt.s32.totalorder %s1137_s17, %s1137_s17 }
   0x5   :  { %p1144_p3 = por %p1143_p2, %p1142_p1 }
   0x7   :  { %p1145_p4 = pnand %p1144_p3, %p1138_p0 }
   0x9   :  { %1148 = shalt.err (!%p1145_p4)
}
   0xa   :  { %s1152_s18 = smov 64   ;;  %s1153_s19 = smov 4  }
   0xb   :  { %25 = dma.hbm_to_vmem [thread:$0]  %s1228_s2, 8192, %s20_s16, [#allocation3], %s1152_s18, %s1152_s18, %s1153_s19  }
   0xc   :  { %1149 = dma.done.wait [#allocation3], 8192  }
   0xd   :  { %1150 = vsyncadd [#allocation3], 4294959104  ;;  %v1154_v0 = vmov 0.0   ;;  %vm1155_vm0 = vmmov 0   ;;  %v1049_v1 = vld [vmem:[%s1229_s3 + $0x38] sm:$0xff]   ;;  %v1052_v4 = vld [vmem:[%s1229_s3 + $0x30] sm:$0xff]  }
   0xe   :  { %1024 = vmatprep.subr.bf16.mxu0 %v1154_v0  ;;  %1040 = vmatprep.mubr.msk.bf16.mxu0 %vm1155_vm0, %v1154_v0  ;;  %v1050_v2 = vld [vmem:[#allocation2 + $0x78] sm:$0xff]   ;;  %v1053_v5 = vld [vmem:[#allocation2 + $0x70] sm:$0xff]   ;;  %v1055_v7 = vld [vmem:[%s1229_s3 + $0x28] sm:$0xff]  }
   0xf   :  { %1025 = vmatpush3.bf16.msra.mxu0 %v1049_v1  ;;  %v1051_v3 = vld [vmem:[#allocation2 + $0x38] sm:$0xff]   ;;  %936 = vmatprep.subr.bf16.mxu1 %v1050_v2  ;;  %v1054_v6 = vld [vmem:[#allocation2 + $0x30] sm:$0xff]   ;;  %v1056_v8 = vld [vmem:[#allocation2 + $0x68] sm:$0xff]  }
  0x10   :  { %1026 = vmatprep.subr.bf16.mxu0 %v1154_v0  ;;  %937 = vmatpush3.bf16.msra.mxu1 %v1051_v3  ;;  %v1057_v9 = vld [vmem:[#allocation2 + $0x28] sm:$0xff]   ;;  %v1058_v10 = vld [vmem:[%s1229_s3 + $0x20] sm:$0xff]   ;;  %v1062_v13 = vld [vmem:[#allocation2 + $0x58] sm:$0xff]  }
  0x11   :  { %938 = vmatprep.subr.bf16.mxu1 %v1053_v5  ;;  %v1059_v11 = vld [vmem:[#allocation2 + $0x60] sm:$0xff]   ;;  %v1061_v14 = vld [vmem:[%s1229_s3 + $0x18] sm:$0xff]   ;;  %v1065_v16 = vld [vmem:[#allocation2 + $0x50] sm:$0xff]  }
  0x12   :  { %v1060_v12 = vld [vmem:[#allocation2 + $0x20] sm:$0xff]   ;;  %v1063_v15 = vld [vmem:[#allocation2 + $0x18] sm:$0xff]   ;;  %v1064_v17 = vld [vmem:[%s1229_s3 + $0x10] sm:$0xff]  }
  0x13   :  { %1027 = vmatpush3.bf16.msra.mxu0 %v1052_v4  ;;  %v1066_v18 = vld [vmem:[#allocation2 + $0x10] sm:$0xff]   ;;  %v1068_v19 = vld [vmem:[#allocation2 + $0x48] sm:$0xff]   ;;  %v1070_v22 = vld [vmem:[%s1229_s3] sm:$0xff]  }
  0x14   :  { %1028 = vmatprep.subr.bf16.mxu0 %v1154_v0  ;;  %939 = vmatpush3.bf16.msra.mxu1 %v1054_v6  ;;  %v1067_v20 = vld [vmem:[%s1229_s3 + $0x8] sm:$0xff]   ;;  %v32_v23 = vld [vmem:[%s1226_s0] sm:$0xff]  ;;  %v1075_v27 = vld [vmem:[#allocation2 + $0xf8] sm:$0xff]  }
  0x15   :  { %940 = vmatprep.subr.bf16.mxu1 %v1056_v8  ;;  %v1069_v21 = vld [vmem:[#allocation2 + $0x8] sm:$0xff]   ;;  %v1071_v24 = vld [vmem:[#allocation2 + $0x40] sm:$0xff]   ;;  %v856_v25 = vcombine.high %v32_v23, %v32_v23  ;;  %v1076_v29 = vld [vmem:[#allocation2 + $0xb8] sm:$0xff]   ;;  %v855_v32 = vcombine.low %v32_v23, %v32_v23 }
  0x16   :  { %v1072_v26 = vld [vmem:[#allocation2] sm:$0xff]   ;;  %v1077_v30 = vld [vmem:[#allocation2 + $0x178] sm:$0xff]   ;;  %v1079_v33 = vld [vmem:[#allocation2 + $0xf0] sm:$0xff]  }
  0x17   :  { %1029 = vmatpush3.bf16.msra.mxu0 %v1055_v7  ;;  %713 = vmatprep.mubr.bf16.mxu1 %v856_v25  ;;  %v164_v28 = vld [vmem:[%s1227_s1] sm:$0xf]  ;;  %v1078_v31 = vld [vmem:[#allocation2 + $0x138] sm:$0xff]   ;;  %v1080_v34 = vld [vmem:[#allocation2 + $0xb0] sm:$0xff]  }
  0x18   :  { %1030 = vmatprep.subr.bf16.mxu0 %v1154_v0  ;;  %941 = vmatpush3.bf16.msra.mxu1 %v1057_v9  ;;  %v1081_v35 = vld [vmem:[#allocation2 + $0x170] sm:$0xff]   ;;  %v1083_v37 = vld [vmem:[#allocation2 + $0xe8] sm:$0xff]   ;;  %v1087_v41 = vld [vmem:[#allocation2 + $0xe0] sm:$0xff]  }
  0x19   :  { %942 = vmatprep.subr.bf16.mxu1 %v1059_v11  ;;  %v1082_v36 = vld [vmem:[#allocation2 + $0x130] sm:$0xff]   ;;  %v1084_v38 = vld [vmem:[#allocation2 + $0xa8] sm:$0xff]   ;;  %v1088_v42 = vld [vmem:[#allocation2 + $0xa0] sm:$0xff]  }
  0x1a   :  { %v1085_v39 = vld [vmem:[#allocation2 + $0x168] sm:$0xff]   ;;  %v1089_v43 = vld [vmem:[#allocation2 + $0x160] sm:$0xff]   ;;  %v1091_v45 = vld [vmem:[#allocation2 + $0xd8] sm:$0xff]  }
  0x1b   :  { %1031 = vmatpush3.bf16.msra.mxu0 %v1058_v10  ;;  %v1086_v40 = vld [vmem:[#allocation2 + $0x128] sm:$0xff]   ;;  %v1090_v44 = vld [vmem:[#allocation2 + $0x120] sm:$0xff]   ;;  %v1092_v46 = vld [vmem:[#allocation2 + $0x98] sm:$0xff]  }
  0x1c   :  { %1032 = vmatprep.subr.bf16.mxu0 %v1154_v0  ;;  %943 = vmatpush3.bf16.msra.mxu1 %v1060_v12  ;;  %v1093_v47 = vld [vmem:[#allocation2 + $0x158] sm:$0xff]   ;;  %v1095_v49 = vld [vmem:[#allocation2 + $0xd0] sm:$0xff]   ;;  %v1099_v53 = vld [vmem:[#allocation2 + $0xc8] sm:$0xff]  }
  0x1d   :  { %944 = vmatprep.subr.bf16.mxu1 %v1062_v13  ;;  %v1094_v48 = vld [vmem:[#allocation2 + $0x118] sm:$0xff]   ;;  %v1096_v50 = vld [vmem:[#allocation2 + $0x90] sm:$0xff]   ;;  %v1100_v54 = vld [vmem:[#allocation2 + $0x88] sm:$0xff]  }
  0x1e   :  { %v1097_v51 = vld [vmem:[#allocation2 + $0x150] sm:$0xff]   ;;  %v1101_v55 = vld [vmem:[#allocation2 + $0x148] sm:$0xff]   ;;  %v1103_v57 = vld [vmem:[#allocation2 + $0xc0] sm:$0xff]  }
  0x1f   :  { %1033 = vmatpush3.bf16.msra.mxu0 %v1061_v14  ;;  %v1098_v52 = vld [vmem:[#allocation2 + $0x110] sm:$0xff]   ;;  %v1102_v56 = vld [vmem:[#allocation2 + $0x108] sm:$0xff]   ;;  %v1104_v59 = vld [vmem:[#allocation2 + $0x80] sm:$0xff]  }
  0x20   :  { %1034 = vmatprep.subr.bf16.mxu0 %v1154_v0  ;;  %945 = vmatpush3.bf16.msra.mxu1 %v1063_v15  ;;  %v33_v58 = vld [vmem:[%s1226_s0 + $0x8] sm:$0xff]  ;;  %v1105_v61 = vld [vmem:[#allocation2 + $0x140] sm:$0xff]   ;;  %v34_v62 = vld [vmem:[%s1226_s0 + $0x10] sm:$0xff] }
  0x21   :  { %946 = vmatprep.subr.bf16.mxu1 %v1065_v16  ;;  %v858_v60 = vcombine.high %v33_v58, %v33_v58  ;;  %v1109_v63 = vld [vmem:[#allocation2 + $0x1f8] sm:$0xff]   ;;  %v1108_v1 = vld [vmem:[#allocation2 + $0x100] sm:$0xff]   ;;  %v857_v2 = vcombine.low %v33_v58, %v33_v58  ;;  %v859_v4 = vcombine.low %v34_v62, %v34_v62  ;;  %v1113_v5 = vld [vmem:[#allocation2 + $0x1f0] sm:$0xff]  }
  0x22   :  { %v1112_v3 = vld [vmem:[#allocation2 + $0x1b8] sm:$0xff]   ;;  %v1114_v6 = vld [vmem:[#allocation2 + $0x1b0] sm:$0xff]   ;;  %v1115_v7 = vld [vmem:[#allocation2 + $0x1e8] sm:$0xff]  }
  0x23   :  { %1035 = vmatpush3.bf16.msra.mxu0 %v1064_v17  ;;  %v1116_v8 = vld [vmem:[#allocation2 + $0x1a8] sm:$0xff]   ;;  %v1117_v9 = vld [vmem:[#allocation2 + $0x1e0] sm:$0xff]   ;;  %v35_v10 = vld [vmem:[%s1226_s0 + $0x18] sm:$0xff] }
  0x24   :  { %1036 = vmatprep.subr.bf16.mxu0 %v1154_v0  ;;  %947 = vmatpush3.bf16.msra.mxu1 %v1066_v18  ;;  %v1118_v11 = vld [vmem:[#allocation2 + $0x1a0] sm:$0xff]   ;;  %v862_v12 = vcombine.high %v35_v10, %v35_v10  ;;  %v1119_v13 = vld [vmem:[#allocation2 + $0x1d8] sm:$0xff]   ;;  %v1121_v15 = vld [vmem:[#allocation2 + $0x1d0] sm:$0xff]  }
  0x25   :  { %948 = vmatprep.subr.bf16.mxu1 %v1068_v19  ;;  %v1120_v14 = vld [vmem:[#allocation2 + $0x198] sm:$0xff]   ;;  %v1122_v16 = vld [vmem:[#allocation2 + $0x190] sm:$0xff]   ;;  %v1123_v17 = vld [vmem:[#allocation2 + $0x1c8] sm:$0xff]  }
  0x26   :  { %v1124_v18 = vld [vmem:[#allocation2 + $0x188] sm:$0xff]   ;;  %v1125_v19 = vld [vmem:[#allocation2 + $0x1c0] sm:$0xff]  }
  0x27   :  { %1037 = vmatpush3.bf16.msra.mxu0 %v1067_v20  ;;  %v1126_v20 = vld [vmem:[#allocation2 + $0x180] sm:$0xff]  }
  0x28   :  { %1038 = vmatprep.subr.bf16.mxu0 %v1154_v0  ;;  %949 = vmatpush3.bf16.msra.mxu1 %v1069_v21  ;;  %v860_v0 = vcombine.high %v34_v62, %v34_v62  ;;  %v861_v21 = vcombine.low %v35_v10, %v35_v10 }
  0x29   :  { %950 = vmatprep.subr.bf16.mxu1 %v1071_v24 }
  0x2b   :  { %1039 = vmatpush3.bf16.msra.mxu0 %v1070_v22 }
  0x2c   :  { %958 = vmatprep.subr.bf16.mxu0 %v1075_v27  ;;  %951 = vmatpush3.bf16.msra.mxu1 %v1072_v26 }
  0x2d   :  { %980 = vmatprep.subr.bf16.mxu1 %v1077_v30 }
  0x2e   :  { %1041 = vmatmul.mubr.bf16.vlgmr.msra.gmra.mxu0 %v164_v28 }
  0x2f   :  { %959 = vmatpush3.bf16.msra.mxu0 %v1076_v29  ;;  %714 = vmatmul.mubr.bf16.vlgmr.msra.gmra.mxu1 %v855_v32 }
  0x30   :  { %960 = vmatprep.subr.bf16.mxu0 %v1079_v33  ;;  %981 = vmatpush3.bf16.msra.mxu1 %v1078_v31 }
  0x31   :  { %982 = vmatprep.subr.bf16.mxu1 %v1081_v35  ;;  %753 = vmatprep.mubr.bf16.mxu0 %v858_v60 }
  0x32   :  { %793 = vmatprep.mubr.bf16.mxu1 %v860_v0 }
  0x33   :  { %961 = vmatpush3.bf16.msra.mxu0 %v1080_v34 }
  0x34   :  { %962 = vmatprep.subr.bf16.mxu0 %v1083_v37  ;;  %983 = vmatpush3.bf16.msra.mxu1 %v1082_v36 }
  0x35   :  { %984 = vmatprep.subr.bf16.mxu1 %v1085_v39 }
  0x37   :  { %963 = vmatpush3.bf16.msra.mxu0 %v1084_v38 }
  0x38   :  { %964 = vmatprep.subr.bf16.mxu0 %v1087_v41  ;;  %985 = vmatpush3.bf16.msra.mxu1 %v1086_v40 }
  0x39   :  { %986 = vmatprep.subr.bf16.mxu1 %v1089_v43 }
  0x3b   :  { %965 = vmatpush3.bf16.msra.mxu0 %v1088_v42 }
  0x3c   :  { %966 = vmatprep.subr.bf16.mxu0 %v1091_v45  ;;  %987 = vmatpush3.bf16.msra.mxu1 %v1090_v44 }
  0x3d   :  { %988 = vmatprep.subr.bf16.mxu1 %v1093_v47 }
  0x3f   :  { %967 = vmatpush3.bf16.msra.mxu0 %v1092_v46 }
  0x40   :  { %968 = vmatprep.subr.bf16.mxu0 %v1095_v49  ;;  %989 = vmatpush3.bf16.msra.mxu1 %v1094_v48 }
  0x41   :  { %990 = vmatprep.subr.bf16.mxu1 %v1097_v51 }
  0x43   :  { %969 = vmatpush3.bf16.msra.mxu0 %v1096_v50 }
  0x44   :  { %970 = vmatprep.subr.bf16.mxu0 %v1099_v53  ;;  %991 = vmatpush3.bf16.msra.mxu1 %v1098_v52 }
  0x45   :  { %992 = vmatprep.subr.bf16.mxu1 %v1101_v55 }
  0x47   :  { %971 = vmatpush3.bf16.msra.mxu0 %v1100_v54 }
  0x48   :  { %972 = vmatprep.subr.bf16.mxu0 %v1103_v57  ;;  %993 = vmatpush3.bf16.msra.mxu1 %v1102_v56 }
  0x49   :  { %994 = vmatprep.subr.bf16.mxu1 %v1105_v61 }
  0x4b   :  { %973 = vmatpush3.bf16.msra.mxu0 %v1104_v59 }
  0x4c   :  { %1002 = vmatprep.subr.bf16.mxu0 %v1109_v63  ;;  %995 = vmatpush3.bf16.msra.mxu1 %v1108_v1 }
  0x4e   :  { %754 = vmatmul.mubr.bf16.vlgmr.msra.gmra.mxu0 %v857_v2 }
  0x4f   :  { %1003 = vmatpush3.bf16.msra.mxu0 %v1112_v3  ;;  %794 = vmatmul.mubr.bf16.vlgmr.msra.gmra.mxu1 %v859_v4 }
  0x50   :  { %1004 = vmatprep.subr.bf16.mxu0 %v1113_v5  ;;  %833 = vmatprep.mubr.bf16.mxu0 %v862_v12 }
  0x53   :  { %1005 = vmatpush3.bf16.msra.mxu0 %v1114_v6 }
  0x54   :  { %1006 = vmatprep.subr.bf16.mxu0 %v1115_v7 }
  0x57   :  { %1007 = vmatpush3.bf16.msra.mxu0 %v1116_v8 }
  0x58   :  { %1008 = vmatprep.subr.bf16.mxu0 %v1117_v9 }
  0x5b   :  { %1009 = vmatpush3.bf16.msra.mxu0 %v1118_v11 }
  0x5c   :  { %1010 = vmatprep.subr.bf16.mxu0 %v1119_v13 }
  0x5f   :  { %1011 = vmatpush3.bf16.msra.mxu0 %v1120_v14 }
  0x60   :  { %1012 = vmatprep.subr.bf16.mxu0 %v1121_v15 }
  0x63   :  { %1013 = vmatpush3.bf16.msra.mxu0 %v1122_v16 }
  0x64   :  { %1014 = vmatprep.subr.bf16.mxu0 %v1123_v17 }
  0x67   :  { %1015 = vmatpush3.bf16.msra.mxu0 %v1124_v18 }
  0x68   :  { %1016 = vmatprep.subr.bf16.mxu0 %v1125_v19 }
  0x6b   :  { %1017 = vmatpush3.bf16.msra.mxu0 %v1126_v20 }
  0x6e   :  { %834 = vmatmul.mubr.bf16.vlgmr.msra.gmra.mxu0 %v861_v21 }
  0xee   :  { %v263_v22 = vpop.f32.mrf.mxu0 }
  0xef   :  { %v952_v23 = vpop.f32.mrf.mxu1 }
  0xf0   :  { %v1042_v24 = vpop.f32.mrf.mxu0 }
  0xf1   :  { %v953_v25 = vpop.f32.mrf.mxu1 }
  0xf2   :  { %v266_v26 = vpop.f32.mrf.mxu0  ;;  %v954_v38 = vadd.f32 %v953_v25, %v952_v23 }
  0xf3   :  { %v955_v28 = vpop.f32.mrf.mxu1 }
  0xf4   :  { %v1043_v27 = vpop.f32.mrf.mxu0  ;;  %v716_v40 = vadd.f32 %v954_v38, %v263_v22 }
  0xf5   :  { %v956_v29 = vpop.f32.mrf.mxu1 }
 0x10e   :  { %v974_v30 = vpop.f32.mrf.mxu0 }
 0x10f   :  { %v996_v32 = vpop.f32.mrf.mxu1 }
 0x110   :  { %v975_v31 = vpop.f32.mrf.mxu0 }
 0x111   :  { %v997_v34 = vpop.f32.mrf.mxu1  ;;  %v976_v39 = vadd.f32 %v975_v31, %v974_v30 }
 0x112   :  { %v977_v33 = vpop.f32.mrf.mxu0  ;;  %v998_v42 = vadd.f32 %v997_v34, %v996_v32 }
 0x113   :  { %v999_v36 = vpop.f32.mrf.mxu1  ;;  %v756_v41 = vadd.f32 %v976_v39, %v716_v40 }
 0x114   :  { %v978_v35 = vpop.f32.mrf.mxu0 }
 0x115   :  { %v1000_v37 = vpop.f32.mrf.mxu1  ;;  %v796_v45 = vadd.f32 %v998_v42, %v756_v41 }
 0x12e   :  { %v1018_v43 = vpop.f32.mrf.mxu0 }
 0x130   :  { %v1019_v44 = vpop.f32.mrf.mxu0 }
 0x131   :  { %v1020_v46 = vadd.f32 %v1019_v44, %v1018_v43 }
 0x132   :  { %v1021_v47 = vpop.f32.mrf.mxu0 }
 0x133   :  { %v836_v48 = vadd.f32 %v1020_v46, %v796_v45 }
 0x134   :  { %v1022_v49 = vpop.f32.mrf.mxu0 }
 0x135   :  { %841 = vst [vmem:[%s1230_s4] sm:$0xff] %v836_v48 }
 0x136   :  { %846 = vsyncpa [#allocation3], 1 }

</bundles_post_ra>
